<compile_context>
chip_gen: v7x
topology: tpu7x:2x2x1
jax: 0.10.0
libtpu: 0.0.40
codegen_flags: <defaults>
</compile_context>

<pallas_src>
import functools
import math

import jax
import jax.numpy as jnp
from jax.experimental import pallas as pl
from jax.experimental.pallas import tpu as pltpu

# Keep the pure-JAX reference at full f32 matmul accuracy so the correctness
# check compares against the same precision regime as the in-kernel MXU dots.
jax.config.update("jax_default_matmul_precision", "highest")

_GELU_C = 0.7978845608028654  # sqrt(2/pi), for GELU(approximate='tanh')

# MXU operand dtype.  float32 keeps the toy-shape self-test comparable with the
# f32 reference at 5e-3; set to jnp.bfloat16 on v6e/v7x for the bf16-native MXU
# (918/996 TF/s) and halved weight VMEM/HBM traffic (loosen the tolerance then).
MXU_DTYPE = jnp.float32

# Scoped-VMEM ceiling: below v7x's 64 MiB physical VMEM, above the 32 MiB default
# so 256-row / 384-512-col double-buffered tiles of the big DiT matmuls fit.
_VMEM_LIMIT = 48 * 1024 * 1024


def _pick_tile(dim, candidates):
    """Largest candidate that evenly divides `dim`, else the full dim (always legal)."""
    for t in candidates:
        if t <= dim and dim % t == 0:
            return t
    return dim


def _row_tile(m):
    # 256-row tiles: fits v7x's 64 MiB VMEM even with Din=4*H f32 inputs.
    return _pick_tile(m, (256, 128))


def _col_tile(n):
    # Lane-dense, 128-multiple output tiles (384 divides H=1152, 512 divides 4*H).
    return _pick_tile(n, (512, 384, 256, 128))


# ---------------------------------------------------------------------------
# 1. adaLN modulation:  SiLU(t) @ W + b  ->  (B, 6H), N-tiled
# ---------------------------------------------------------------------------
def _adaln_kernel(t_ref, w_ref, b_ref, o_ref):
    t = t_ref[...].astype(jnp.float32)
    s = t * jax.nn.sigmoid(t)  # SiLU (recomputed per column tile; negligible)
    y = jnp.dot(s.astype(MXU_DTYPE), w_ref[...].astype(MXU_DTYPE),
                preferred_element_type=jnp.float32) + b_ref[...].astype(jnp.float32)
    o_ref[...] = y.astype(o_ref.dtype)


def adaln_modulation_pallas(t, w, b):
    B, H = t.shape
    N = w.shape[1]
    tn = _col_tile(N)
    return pl.pallas_call(
        _adaln_kernel,
        out_shape=jax.ShapeDtypeStruct((B, N), t.dtype),
        grid=(N // tn,),
        in_specs=[
            pl.BlockSpec((B, H), lambda i: (0, 0)),
            pl.BlockSpec((H, tn), lambda i: (0, i)),
            pl.BlockSpec((1, tn), lambda i: (0, i)),
        ],
        out_specs=pl.BlockSpec((B, tn), lambda i: (0, i)),
        compiler_params=pltpu.CompilerParams(
            dimension_semantics=("parallel",), vmem_limit_bytes=_VMEM_LIMIT),
    )(t, w, b.reshape(1, N))


# ---------------------------------------------------------------------------
# 2. Fused LayerNorm(no affine) + modulate + linear (+ optional tanh-GELU)
#    grid (B, S//tS, N//tn); LN reduces over H only so S/N tiling is exact.
# ---------------------------------------------------------------------------
def _ln_mod_linear_kernel(x_ref, shift_ref, scale_ref, w_ref, b_ref, o_ref, *,
                          eps, activation):
    x = x_ref[0].astype(jnp.float32)                       # (tS, H)
    mu = jnp.mean(x, axis=-1, keepdims=True)
    xc = x - mu
    var = jnp.mean(xc * xc, axis=-1, keepdims=True)
    xm = (xc * jax.lax.rsqrt(var + eps)) * (1.0 + scale_ref[0].astype(jnp.float32)) \
         + shift_ref[0].astype(jnp.float32)                # (tS, H)
    y = jnp.dot(xm.astype(MXU_DTYPE), w_ref[...].astype(MXU_DTYPE),
                preferred_element_type=jnp.float32) + b_ref[...].astype(jnp.float32)
    if activation == "gelu_tanh":
        y = 0.5 * y * (1.0 + jnp.tanh(_GELU_C * (y + 0.044715 * y * y * y)))
    o_ref[0] = y.astype(o_ref.dtype)


def ln_mod_linear_pallas(x, shift, scale, w, b, activation=None, eps=1e-6):
    B, S, H = x.shape
    N = w.shape[1]
    tS = _row_tile(S)
    tn = _col_tile(N)
    return pl.pallas_call(
        functools.partial(_ln_mod_linear_kernel, eps=eps, activation=activation),
        out_shape=jax.ShapeDtypeStruct((B, S, N), x.dtype),
        grid=(B, S // tS, N // tn),
        in_specs=[
            pl.BlockSpec((1, tS, H), lambda b, si, ni: (b, si, 0)),
            pl.BlockSpec((1, 1, H), lambda b, si, ni: (b, 0, 0)),
            pl.BlockSpec((1, 1, H), lambda b, si, ni: (b, 0, 0)),
            pl.BlockSpec((H, tn), lambda b, si, ni: (0, ni)),
            pl.BlockSpec((1, tn), lambda b, si, ni: (0, ni)),
        ],
        out_specs=pl.BlockSpec((1, tS, tn), lambda b, si, ni: (b, si, ni)),
        compiler_params=pltpu.CompilerParams(
            dimension_semantics=("parallel", "parallel", "parallel"),
            vmem_limit_bytes=_VMEM_LIMIT),
    )(x, shift.reshape(B, 1, H), scale.reshape(B, 1, H), w, b.reshape(1, N))


# ---------------------------------------------------------------------------
# 3. Plain (M,N)-tiled linear: y = x @ W + b   (cross-attention K/V path only)
# ---------------------------------------------------------------------------
def _linear_kernel(x_ref, w_ref, b_ref, o_ref):
    y = jnp.dot(x_ref[...].astype(MXU_DTYPE), w_ref[...].astype(MXU_DTYPE),
                preferred_element_type=jnp.float32) + b_ref[...].astype(jnp.float32)
    o_ref[...] = y.astype(o_ref.dtype)


def linear_pallas(x2d, w, b):
    M, K = x2d.shape
    N = w.shape[1]
    tm = _row_tile(M)
    tn = _col_tile(N)
    return pl.pallas_call(
        _linear_kernel,
        out_shape=jax.ShapeDtypeStruct((M, N), x2d.dtype),
        grid=(M // tm, N // tn),
        in_specs=[
            pl.BlockSpec((tm, K), lambda i, j: (i, 0)),
            pl.BlockSpec((K, tn), lambda i, j: (0, j)),
            pl.BlockSpec((1, tn), lambda i, j: (0, j)),
        ],
        out_specs=pl.BlockSpec((tm, tn), lambda i, j: (i, j)),
        compiler_params=pltpu.CompilerParams(
            dimension_semantics=("parallel", "parallel"),
            vmem_limit_bytes=_VMEM_LIMIT),
    )(x2d, w, b.reshape(1, N))


# ---------------------------------------------------------------------------
# 4. Flash attention: grid (B, heads, Sq//tq, Skv//tk), kv axis "arbitrary",
#    online softmax with VMEM scratch; additive key-mask bias.
# ---------------------------------------------------------------------------
def _flash_attn_kernel(q_ref, k_ref, v_ref, bias_ref, o_ref,
                       m_sc, l_sc, acc_sc, *, scale):
    ki = pl.program_id(3)

    @pl.when(ki == 0)
    def _():
        m_sc[...] = jnp.full_like(m_sc, -jnp.inf)
        l_sc[...] = jnp.zeros_like(l_sc)
        acc_sc[...] = jnp.zeros_like(acc_sc)

    q = (q_ref[0, 0].astype(jnp.float32) * scale).astype(MXU_DTYPE)    # (tq, hd)
    k = k_ref[0, 0].astype(MXU_DTYPE)                                  # (tk, hd)
    s = jax.lax.dot_general(q, k, (((1,), (1,)), ((), ())),
                            preferred_element_type=jnp.float32)        # (tq, tk)
    s = s + bias_ref[0].astype(jnp.float32)                            # (1, tk) bcast

    m_prev = m_sc[...]
    m_new = jnp.maximum(m_prev, jnp.max(s, axis=-1, keepdims=True))
    alpha = jnp.exp(m_prev - m_new)
    p = jnp.exp(s - m_new)
    l_sc[...] = alpha * l_sc[...] + jnp.sum(p, axis=-1, keepdims=True)
    acc_sc[...] = alpha * acc_sc[...] + jnp.dot(
        p.astype(MXU_DTYPE), v_ref[0, 0].astype(MXU_DTYPE),
        preferred_element_type=jnp.float32)
    m_sc[...] = m_new

    @pl.when(ki == pl.num_programs(3) - 1)
    def _():
        inv_l = pl.reciprocal(l_sc[...], approx=True)
        o_ref[0, 0] = (acc_sc[...] * inv_l).astype(o_ref.dtype)


def flash_attention_pallas(q, k, v, bias, scale):
    """q/k/v: (B, nh, S, hd); bias: (B, 1, Skv) additive key bias."""
    B, nh, Sq, hd = q.shape
    Skv = k.shape[2]
    tq = _pick_tile(Sq, (256, 128))   # 256 for v6e/v7x MXU; falls back to full dim
    tk = _pick_tile(Skv, (256, 128))
    return pl.pallas_call(
        functools.partial(_flash_attn_kernel, scale=scale),
        out_shape=jax.ShapeDtypeStruct((B, nh, Sq, hd), q.dtype),
        grid=(B, nh, Sq // tq, Skv // tk),
        in_specs=[
            pl.BlockSpec((1, 1, tq, hd), lambda b, h, qi, ki: (b, h, qi, 0)),
            pl.BlockSpec((1, 1, tk, hd), lambda b, h, qi, ki: (b, h, ki, 0)),
            pl.BlockSpec((1, 1, tk, hd), lambda b, h, qi, ki: (b, h, ki, 0)),
            pl.BlockSpec((1, 1, tk), lambda b, h, qi, ki: (b, 0, ki)),
        ],
        out_specs=pl.BlockSpec((1, 1, tq, hd), lambda b, h, qi, ki: (b, h, qi, 0)),
        scratch_shapes=[
            pltpu.VMEM((tq, 1), jnp.float32),   # running max
            pltpu.VMEM((tq, 1), jnp.float32),   # running denom
            pltpu.VMEM((tq, hd), jnp.float32),  # running accumulator
        ],
        compiler_params=pltpu.CompilerParams(
            dimension_semantics=("parallel", "parallel", "parallel", "arbitrary"),
            vmem_limit_bytes=_VMEM_LIMIT),
    )(q, k, v, bias)


# ---------------------------------------------------------------------------
# 5. Output projection fused with gate * (.) + residual, tiled over (B, S, N)
# ---------------------------------------------------------------------------
def _proj_gate_residual_kernel(h_ref, w_ref, b_ref, gate_ref, res_ref, o_ref):
    y = jnp.dot(h_ref[0].astype(MXU_DTYPE), w_ref[...].astype(MXU_DTYPE),
                preferred_element_type=jnp.float32) + b_ref[...].astype(jnp.float32)
    o_ref[0] = (res_ref[0].astype(jnp.float32)
                + gate_ref[0].astype(jnp.float32) * y).astype(o_ref.dtype)


def proj_gate_residual_pallas(h, w, b, gate, res):
    B, S, Din = h.shape
    H = w.shape[1]
    tS = _row_tile(S)
    tn = _col_tile(H)
    return pl.pallas_call(
        _proj_gate_residual_kernel,
        out_shape=jax.ShapeDtypeStruct((B, S, H), res.dtype),
        grid=(B, S // tS, H // tn),
        in_specs=[
            pl.BlockSpec((1, tS, Din), lambda b, si, ni: (b, si, 0)),
            pl.BlockSpec((Din, tn), lambda b, si, ni: (0, ni)),
            pl.BlockSpec((1, tn), lambda b, si, ni: (0, ni)),
            pl.BlockSpec((1, 1, tn), lambda b, si, ni: (b, 0, ni)),
            pl.BlockSpec((1, tS, tn), lambda b, si, ni: (b, si, ni)),
        ],
        out_specs=pl.BlockSpec((1, tS, tn), lambda b, si, ni: (b, si, ni)),
        compiler_params=pltpu.CompilerParams(
            dimension_semantics=("parallel", "parallel", "parallel"),
            vmem_limit_bytes=_VMEM_LIMIT),
    )(h, w, b.reshape(1, H), gate.reshape(B, 1, H), res)


# ---------------------------------------------------------------------------
# DiTBlock (single-device path; CrossAttention with bias=True, sdpa=True)
# ---------------------------------------------------------------------------
class DiTBlockPallas:
    def __init__(self, hidden_size, num_heads, cross_attention_dim=None,
                 mlp_ratio=4.0, *, key):
        assert hidden_size % num_heads == 0
        self.hidden_size = hidden_size
        self.num_heads = num_heads
        self.head_dim = hidden_size // num_heads
        self.eps = 1e-6
        self.cross_dim = hidden_size if cross_attention_dim is None else cross_attention_dim
        mlp_hidden = int(hidden_size * mlp_ratio)
        H = hidden_size
        ks = jax.random.split(key, 16)
        wscale, bscale = 0.1, 0.05
        n = lambda k, shape, s: jax.random.normal(k, shape, jnp.float32) * s
        self.w_ada = n(ks[0], (H, 6 * H), wscale)
        self.b_ada = n(ks[1], (6 * H,), bscale)
        self.w_q = n(ks[2], (H, H), wscale)
        self.b_q = n(ks[3], (H,), bscale)
        self.w_k = n(ks[4], (self.cross_dim, H), wscale)
        self.b_k = n(ks[5], (H,), bscale)
        self.w_v = n(ks[6], (self.cross_dim, H), wscale)
        self.b_v = n(ks[7], (H,), bscale)
        self.w_o = n(ks[8], (H, H), wscale)
        self.b_o = n(ks[9], (H,), bscale)
        self.w_fc1 = n(ks[10], (H, mlp_hidden), wscale)
        self.b_fc1 = n(ks[11], (mlp_hidden,), bscale)
        self.w_fc2 = n(ks[12], (mlp_hidden, H), wscale)
        self.b_fc2 = n(ks[13], (H,), bscale)
        if self.cross_dim == H:
            # Fused [Wq | Wk | Wv]: self-attention runs LN+modulate+QKV in a single
            # pallas_call so the modulated activation never round-trips HBM.
            self.w_qkv = jnp.concatenate([self.w_q, self.w_k, self.w_v], axis=1)
            self.b_qkv = jnp.concatenate([self.b_q, self.b_k, self.b_v], axis=0)
        else:
            self.w_qkv = None
            self.b_qkv = None

    def __call__(self, x, attention_mask, t, context=None):
        B, S, H = x.shape
        nh, hd = self.num_heads, self.head_dim

        ada = adaln_modulation_pallas(t, self.w_ada, self.b_ada)        # (B, 6H)
        (shift_msa, scale_msa, gate_msa,
         shift_mlp, scale_mlp, gate_mlp) = [ada[:, i * H:(i + 1) * H] for i in range(6)]

        # ---- attention branch (LN+modulate fused into the QKV projection) ------
        if context is None and self.w_qkv is not None:
            qkv = ln_mod_linear_pallas(x, shift_msa, scale_msa,
                                       self.w_qkv, self.b_qkv, eps=self.eps)  # (B,S,3H)
            q = qkv[..., :H]
            k = qkv[..., H:2 * H]
            v = qkv[..., 2 * H:]
        else:
            q = ln_mod_linear_pallas(x, shift_msa, scale_msa,
                                     self.w_q, self.b_q, eps=self.eps)
            Bc, Skv_c, Dc = context.shape
            k = linear_pallas(context.reshape(Bc * Skv_c, Dc),
                              self.w_k, self.b_k).reshape(Bc, Skv_c, H)
            v = linear_pallas(context.reshape(Bc * Skv_c, Dc),
                              self.w_v, self.b_v).reshape(Bc, Skv_c, H)

        Skv = k.shape[1]
        # (B, S, H) -> (B, nh, S, hd): XLA reshuffle feeding the head-parallel kernel.
        qh = q.reshape(B, S, nh, hd).transpose(0, 2, 1, 3)
        kh = k.reshape(B, Skv, nh, hd).transpose(0, 2, 1, 3)
        vh = v.reshape(B, Skv, nh, hd).transpose(0, 2, 1, 3)

        if attention_mask is None:
            bias = jnp.zeros((B, 1, Skv), jnp.float32)
        else:
            # TODO(synk): open_sora's CrossAttention mask preparation is not in the
            # spec; attention_mask is interpreted as a (B, Skv) keep-mask
            # (1 = attend, 0 = masked) converted to an additive key bias.
            bias = jnp.where(attention_mask.astype(jnp.bool_), 0.0, -1e9)
            bias = bias.astype(jnp.float32).reshape(B, 1, Skv)

        scale = 1.0 / math.sqrt(hd)
        attn = flash_attention_pallas(qh, kh, vh, bias, scale)          # (B, nh, S, hd)
        attn = attn.transpose(0, 2, 1, 3).reshape(B, S, H)
        x = proj_gate_residual_pallas(attn, self.w_o, self.b_o, gate_msa, x)

        # ---- MLP branch (LN+modulate fused into fc1 + tanh-GELU epilogue) ------
        h1 = ln_mod_linear_pallas(x, shift_mlp, scale_mlp, self.w_fc1, self.b_fc1,
                                  activation="gelu_tanh", eps=self.eps)
        x = proj_gate_residual_pallas(h1, self.w_fc2, self.b_fc2, gate_mlp, x)
        return x


# ---------------------------------------------------------------------------
# Pure-JAX reference (for correctness check)
# ---------------------------------------------------------------------------
def dit_block_reference(blk, x, attention_mask, t, context=None):
    H = blk.hidden_size
    sil = t * jax.nn.sigmoid(t)
    ada = sil @ blk.w_ada + blk.b_ada
    shift_msa, scale_msa, gate_msa, shift_mlp, scale_mlp, gate_mlp = (
        [ada[:, i * H:(i + 1) * H] for i in range(6)])

    def layernorm(y):
        mu = jnp.mean(y, axis=-1, keepdims=True)
        var = jnp.mean((y - mu) ** 2, axis=-1, keepdims=True)
        return (y - mu) * jax.lax.rsqrt(var + 1e-6)

    def modulate(y, shift, scale):
        return y * (1.0 + scale[:, None, :]) + shift[:, None, :]

    xm = modulate(layernorm(x), shift_msa, scale_msa)
    kv_in = xm if context is None else context
    q = xm @ blk.w_q + blk.b_q
    k = kv_in @ blk.w_k + blk.b_k
    v = kv_in @ blk.w_v + blk.b_v
    B, S, _ = q.shape
    Skv = k.shape[1]
    nh, hd = blk.num_heads, H // blk.num_heads
    qh = q.reshape(B, S, nh, hd).transpose(0, 2, 1, 3)
    kh = k.reshape(B, Skv, nh, hd).transpose(0, 2, 1, 3)
    vh = v.reshape(B, Skv, nh, hd).transpose(0, 2, 1, 3)
    scores = jnp.einsum("bhqd,bhkd->bhqk", qh, kh) / math.sqrt(hd)
    if attention_mask is not None:
        kbias = jnp.where(attention_mask.astype(bool), 0.0, -1e9)
        scores = scores + kbias[:, None, None, :]
    attn = jax.nn.softmax(scores, axis=-1)
    out = jnp.einsum("bhqk,bhkd->bhqd", attn, vh).transpose(0, 2, 1, 3).reshape(B, S, H)
    x = x + gate_msa[:, None, :] * (out @ blk.w_o + blk.b_o)
    xm2 = modulate(layernorm(x), shift_mlp, scale_mlp)
    h = xm2 @ blk.w_fc1 + blk.b_fc1
    h = 0.5 * h * (1.0 + jnp.tanh(_GELU_C * (h + 0.044715 * h ** 3)))
    x = x + gate_mlp[:, None, :] * (h @ blk.w_fc2 + blk.b_fc2)
    return x


if __name__ == "__main__":
    key = jax.random.PRNGKey(0)
    k_param, k_x, k_t = jax.random.split(key, 3)

    B, S, H, num_heads = 2, 8, 32, 4
    blk = DiTBlockPallas(H, num_heads, mlp_ratio=4.0, key=k_param)

    x = jax.random.normal(k_x, (B, S, H), jnp.float32)
    t = jax.random.normal(k_t, (B, H), jnp.float32)
    attention_mask = jnp.ones((B, S), jnp.int32).at[1, S - 1].set(0)

    out = blk(x, attention_mask, t, context=None)
    out = jax.block_until_ready(out)
    assert out.shape == (B, S, H)

    ref = dit_block_reference(blk, x, attention_mask, t, context=None)
    err = float(jnp.max(jnp.abs(out - ref)))
    assert err < 5e-3, f"mismatch vs pure-JAX reference: max abs err = {err}"

    print("KERNEL_OK")
</pallas_src>

<mosaic_0001>
module attributes {stable_mosaic.version = 11 : i64} {
  func.func @_adaln_kernel(%arg0: i32, %arg1: memref<2x32xf32, #tpu.memory_space<vmem>>, %arg2: memref<32x192xf32, #tpu.memory_space<vmem>>, %arg3: memref<1x192xf32, #tpu.memory_space<vmem>>, %arg4: memref<2x192xf32, #tpu.memory_space<vmem>>) attributes {dimension_semantics = [#tpu.dimension_semantics<parallel>], iteration_bounds = array<i64: 1>, scalar_prefetch = 0 : i64, scratch_operands = 0 : i64, tpu.core_type = #tpu.core_type<tc>, window_params = [{pipeline_mode = #tpu.pipeline_mode<synchronous>, transform_indices = @transform_0, window_bounds = array<i64: 2, 32>}, {transform_indices = @transform_1, window_bounds = array<i64: 32, 192>}, {transform_indices = @transform_2, window_bounds = array<i64: 1, 192>}, {transform_indices = @transform_3, window_bounds = array<i64: 2, 192>}]} {
    %c0 = arith.constant 0 : index
    %c0_0 = arith.constant 0 : index
    %0 = vector.load %arg1[%c0, %c0_0] : memref<2x32xf32, #tpu.memory_space<vmem>>, vector<2x32xf32>
    %1 = arith.negf %0 : vector<2x32xf32>
    %2 = math.exp %1 : vector<2x32xf32>
    %cst = arith.constant 1.000000e+00 : f32
    %3 = vector.broadcast %cst : f32 to vector<2x32xf32>
    %4 = arith.addf %3, %2 : vector<2x32xf32>
    %5 = arith.divf %3, %4 : vector<2x32xf32>
    %6 = arith.mulf %0, %5 : vector<2x32xf32>
    %c0_1 = arith.constant 0 : index
    %c0_2 = arith.constant 0 : index
    %7 = vector.load %arg2[%c0_1, %c0_2] : memref<32x192xf32, #tpu.memory_space<vmem>>, vector<32x192xf32>
    %cst_3 = arith.constant dense<0.000000e+00> : vector<2x192xf32>
    %8 = tpu.matmul %6, %7, %cst_3 {dimension_numbers = #tpu.dot_dimension_numbers<[1], [0], [0], [1], [0, 0, 1, 1], [], []>, precision = #tpu.contract_precision<fp32>} : vector<2x32xf32>, vector<32x192xf32>, vector<2x192xf32> -> vector<2x192xf32>
    %c0_4 = arith.constant 0 : index
    %c0_5 = arith.constant 0 : index
    %9 = vector.load %arg3[%c0_4, %c0_5] : memref<1x192xf32, #tpu.memory_space<vmem>>, vector<1x192xf32>
    %10 = vector.broadcast %9 : vector<1x192xf32> to vector<2x192xf32>
    %11 = arith.addf %8, %10 : vector<2x192xf32>
    %c0_6 = arith.constant 0 : index
    %c0_7 = arith.constant 0 : index
    %12 = vector.load %arg4[%c0_6, %c0_7] : memref<2x192xf32, #tpu.memory_space<vmem>>, vector<2x192xf32>
    tpu.vector_store %arg4[%c0_6, %c0_7], %11 {strides = array<i32>} : memref<2x192xf32, #tpu.memory_space<vmem>>, vector<2x192xf32>,
    return
  }
  func.func @transform_0(%arg0: i32) -> (i32, i32) {
    %c0_i32 = arith.constant 0 : i32
    %c0_i32_0 = arith.constant 0 : i32
    %c0_i32_1 = arith.constant 0 : i32
    return %c0_i32, %c0_i32_0 : i32, i32
  }
  func.func @transform_1(%arg0: i32) -> (i32, i32) {
    %c0_i32 = arith.constant 0 : i32
    %c0_i32_0 = arith.constant 0 : i32
    return %c0_i32, %arg0 : i32, i32
  }
  func.func @transform_2(%arg0: i32) -> (i32, i32) {
    %c0_i32 = arith.constant 0 : i32
    %c0_i32_0 = arith.constant 0 : i32
    return %c0_i32, %arg0 : i32, i32
  }
  func.func @transform_3(%arg0: i32) -> (i32, i32) {
    %c0_i32 = arith.constant 0 : i32
    %c0_i32_0 = arith.constant 0 : i32
    return %c0_i32, %arg0 : i32, i32
  }
}

</mosaic_0001>

<bundles_post_ra>
// kernel: tpu_custom_call.1
= control target key start
LH: loop header
LB: loop body
LE: loop exit
PB: predicated region body
PF: predicated region fallthrough
CT: control target
= control target key end

     0   :  { %8 = vsyncpa [#allocation3], 0  ;;  %s900_s0 = inlined_call_operand.hbm [shape: f32[2,32], index: 0, kind: input, shape index: {}]   ;;  %s901_s1 = inlined_call_operand.hbm [shape: f32[32,192], index: 1, kind: input, shape index: {}]   ;;  %s902_s2 = inlined_call_operand.vmem [shape: f32[1,192], index: 2, kind: input, shape index: {}]   ;;  %s903_s3 = inlined_call_operand.hbm [shape: f32[2,192], index: 3, kind: output, shape index: {}]  }
   0x1   :  { %9 = vsyncpa [#allocation6], 0 }
   0x2   :  { %10 = vsyncpa [#allocation4], 0  ;;  %s791_s12 = smov [#allocation2]   ;;  %s792_s14 = smov [#allocation5]  }
   0x3   :  { %s17_s13 = sshll.u32 %s791_s12, 4  ;;  %s26_s15 = sshll.u32 %s792_s14, 4  ;;  %s18_s13 = int_to_ptr.vmem [resolvable:$true] %s17_s13  ;;  %s818_s15 = int_to_ptr.vmem [resolvable:$true] %s26_s15 }
   0x4   :  { %s719_s18 = scalar_lea.hbm %s900_s0, 32 }
   0x5   :  { %p720_p0 = scmp.ne.s32.totalorder %s900_s0, %s719_s18  ;;  %p723_p1 = scmp.lt.u32.totalorder %s719_s18, %s900_s0 }
   0x7   :  { %p725_p2 = pnand %p723_p1, %p720_p0 }
   0x9   :  { %728 = shalt.err (!%p725_p2)
}
   0xa   :  { %s729_s23 = scalar_lea.vmem %s18_s13, 32  ;;  %p734_p4 = scmp.lt.s32.totalorder %s18_s13, %s18_s13 }
   0xb   :  { %p730_p3 = scmp.ne.s32.totalorder %s18_s13, %s729_s23  ;;  %p735_p5 = scmp.lt.s32.totalorder %s729_s23, %s729_s23 }
   0xd   :  { %p736_p6 = por %p735_p5, %p734_p4 }
   0xf   :  { %p737_p7 = pnand %p736_p6, %p730_p3 }
  0x11   :  { %740 = shalt.err (!%p737_p7)
}
  0x12   :  { %20 = dma.hbm_to_vmem [thread:$0]  %s900_s0, 32, %s18_s13, [#allocation3]  }
  0x13   :  { %s741_s28 = scalar_lea.hbm %s901_s1, 1024 }
  0x14   :  { %p742_p8 = scmp.ne.s32.totalorder %s901_s1, %s741_s28  ;;  %p745_p9 = scmp.lt.u32.totalorder %s741_s28, %s901_s1 }
  0x16   :  { %p747_p10 = pnand %p745_p9, %p742_p8 }
  0x18   :  { %750 = shalt.err (!%p747_p10)
}
  0x19   :  { %s751_s6 = scalar_lea.vmem %s818_s15, 1024  ;;  %p756_p12 = scmp.lt.s32.totalorder %s818_s15, %s818_s15 }
  0x1a   :  { %p752_p11 = scmp.ne.s32.totalorder %s818_s15, %s751_s6  ;;  %p757_p13 = scmp.lt.s32.totalorder %s751_s6, %s751_s6 }
  0x1c   :  { %p758_p0 = por %p757_p13, %p756_p12 }
  0x1e   :  { %p759_p1 = pnand %p758_p0, %p752_p11 }
  0x20   :  { %762 = shalt.err (!%p759_p1)
}
  0x21   :  { %s793_s0 = smov 256   ;;  %s794_s7 = smov 16  }
  0x22   :  { %32 = dma.hbm_to_vmem [thread:$0]  %s901_s1, 1024, %s818_s15, [#allocation6], %s793_s0, %s793_s0, %s794_s7  }
  0x23   :  { %785 = dma.done.wait [#allocation3], 32  }
  0x24   :  { %786 = vsyncadd [#allocation3], 4294967264 }
  0x25   :  { %787 = dma.done.wait [#allocation6], 1024  }
  0x26   :  { %788 = vsyncadd [#allocation6], 4294966272  ;;  %v795_v0 = vmov 0.0   ;;  %v50_v1 = vld [vmem:[#allocation5 + $0x8] sm:$0xff]  ;;  %v52_v2 = vld [vmem:[#allocation5 + $0x18] sm:$0xff]  ;;  %vm69_vm0 = vcmask 261120  }
  0x27   :  { %430 = vmatprep.mubr.f32.mxu0 %v795_v0  ;;  %145 = vmatprep.mubr.f32.mxu1 %v795_v0  ;;  %v49_v3 = vld [vmem:[#allocation5] sm:$0xff]  ;;  %v73_v4 = vand.u32 4294901760, %v50_v1  ;;  %v77_v5 = vand.u32 4294901760, %v52_v2  ;;  %v51_v6 = vld [vmem:[#allocation5 + $0x10] sm:$0xff]  ;;  %v54_v8 = vld [vmem:[#allocation5 + $0x28] sm:$0xff]  ;;  %vm627_vm1 = vcmask 1041408  }
  0x28   :  { %v75_v7 = vand.u32 4294901760, %v49_v3  ;;  %v56_v9 = vld [vmem:[#allocation5 + $0x38] sm:$0xff]  ;;  %v79_v10 = vand.u32 4294901760, %v51_v6  ;;  %v81_v11 = vand.u32 4294901760, %v54_v8  ;;  %v53_v13 = vld [vmem:[#allocation5 + $0x20] sm:$0xff]  ;;  %v55_v14 = vld [vmem:[#allocation5 + $0x30] sm:$0xff] }
  0x29   :  { %v85_v12 = vand.u32 4294901760, %v56_v9  ;;  %v851_v15 = vpack.c.bf16 %v77_v5, %v73_v4  ;;  %v853_v16 = vsub.f32 %v50_v1, %v73_v4  ;;  %v855_v17 = vsub.f32 %v52_v2, %v77_v5  ;;  %v41_v18 = vld [vmem:[#allocation2] sm:$0x3]  ;;  %s797_s11 = smov [#allocation7]  }
  0x2a   :  { %v857_v19 = vpack.c.bf16 %v79_v10, %v75_v7  ;;  %v83_v21 = vand.u32 4294901760, %v53_v13  ;;  %v87_v22 = vand.u32 4294901760, %v55_v14  ;;  %v647_v23 = vmul.f32 -1.442695, %v41_v18  ;;  %s637_s12 = sshll.u32 %s797_s11, 4  ;;  %s638_s12 = int_to_ptr.vmem [resolvable:$true] %s637_s12 }
  0x2b   :  { %v859_v20 = vpack.c.bf16 %v85_v12, %v81_v11  ;;  %673 = vmatprep.subr.bf16.mxu0 %v851_v15  ;;  %649 = vmatprep.subr.bf16.mxu1 %v851_v15  ;;  %v159_v24 = vand.u32 4294901760, %v853_v16  ;;  %v171_v25 = vand.u32 4294901760, %v855_v17  ;;  %v164_v35 = vsub.f32 %v49_v3, %v75_v7  ;;  %p768_p3 = scmp.lt.s32.totalorder %s638_s12, %s638_s12 }
  0x2c   :  { %675 = vmatpush1.bf16.msra.mxu0 %v857_v19  ;;  %651 = vmatpush1.bf16.msra.mxu1 %v857_v19  ;;  %v868_v26 = vpack.c.bf16 %v87_v22, %v83_v21  ;;  %715 = vpow2.f32 %v647_v23  ;;  %v176_v36 = vsub.f32 %v51_v6, %v79_v10  ;;  %v182_v37 = vsub.f32 %v54_v8, %v81_v11 }
  0x2d   :  { %677 = vmatprep.subr.bf16.mxu0 %v859_v20  ;;  %653 = vmatprep.subr.bf16.mxu1 %v859_v20  ;;  %v680_v27 = vpack.c.bf16 %v171_v25, %v159_v24  ;;  %v160_v28 = vsub.f32 %v853_v16, %v159_v24  ;;  %v172_v29 = vsub.f32 %v855_v17, %v171_v25  ;;  %v165_v39 = vand.u32 4294901760, %v164_v35 }
  0x2e   :  { %v194_v38 = vsub.f32 %v56_v9, %v85_v12  ;;  %v188_v40 = vsub.f32 %v53_v13, %v83_v21  ;;  %v200_v41 = vsub.f32 %v55_v14, %v87_v22  ;;  %v177_v42 = vand.u32 4294901760, %v176_v36 }
  0x2f   :  { %v161_v30 = vand.u32 4294901760, %v160_v28  ;;  %v173_v31 = vand.u32 4294901760, %v172_v29  ;;  %v183_v44 = vand.u32 4294901760, %v182_v37  ;;  %v166_v47 = vsub.f32 %v164_v35, %v165_v39 }
  0x30   :  { %679 = vmatpush1.bf16.msra.mxu0 %v868_v26  ;;  %655 = vmatpush1.bf16.msra.mxu1 %v868_v26  ;;  %v195_v45 = vand.u32 4294901760, %v194_v38  ;;  %v178_v49 = vsub.f32 %v176_v36, %v177_v42  ;;  %v189_v50 = vand.u32 4294901760, %v188_v40  ;;  %v201_v51 = vand.u32 4294901760, %v200_v41 }
  0x31   :  { %681 = vmatprep.subr.bf16.mxu0 %v680_v27  ;;  %v656_v32 = vpack.c.bf16 %v173_v31, %v161_v30  ;;  %v184_v53 = vsub.f32 %v182_v37, %v183_v44  ;;  %v682_v56 = vpack.c.bf16 %v177_v42, %v165_v39  ;;  %v167_v57 = vand.u32 4294901760, %v166_v47 }
  0x32   :  { %v196_v54 = vsub.f32 %v194_v38, %v195_v45  ;;  %v179_v58 = vand.u32 4294901760, %v178_v49  ;;  %v190_v59 = vsub.f32 %v188_v40, %v189_v50  ;;  %v202_v60 = vsub.f32 %v200_v41, %v201_v51 }
  0x33   :  { %657 = vmatprep.subr.bf16.mxu1 %v656_v32  ;;  %v684_v62 = vpack.c.bf16 %v195_v45, %v183_v44  ;;  %v185_v63 = vand.u32 4294901760, %v184_v53  ;;  %v686_v4 = vpack.c.bf16 %v201_v51, %v189_v50  ;;  %v664_v10 = vpack.c.bf16 %v855_v17, %v853_v16  ;;  %v57_v17 = vld [vmem:[%s902_s2] sm:$0x3]  ;;  %s763_s2 = scalar_lea.vmem %s638_s12, 64 }
  0x34   :  { %v197_v1 = vand.u32 4294901760, %v196_v54  ;;  %v658_v3 = vpack.c.bf16 %v179_v58, %v167_v57  ;;  %v191_v5 = vand.u32 4294901760, %v190_v59  ;;  %v203_v6 = vand.u32 4294901760, %v202_v60  ;;  %p764_p2 = scmp.ne.s32.totalorder %s638_s12, %s763_s2  ;;  %p769_p4 = scmp.lt.s32.totalorder %s763_s2, %s763_s2 }
  0x35   :  { %v666_v11 = vpack.c.bf16 %v176_v36, %v164_v35  ;;  %v668_v12 = vpack.c.bf16 %v194_v38, %v182_v37  ;;  %v670_v13 = vpack.c.bf16 %v200_v41, %v188_v40  ;;  %v59_v14 = vlaneseq }
  0x36   :  { %v716_v33 = vpop.eup %715  ;;  %v660_v8 = vpack.c.bf16 %v197_v1, %v185_v63  ;;  %v662_v9 = vpack.c.bf16 %v203_v6, %v191_v5  ;;  %vm628_vm2 = vcmask 519170   ;;  %p770_p5 = por %p769_p4, %p768_p3 }
  0x37   :  { %v45_v34 = vadd.f32 1.0, %v716_v33  ;;  %vm629_vm3 = vmor %vm628_vm2, %vm627_vm1 }
  0x38   :  { %p771_p6 = pnand %p770_p5, %p764_p2 }
  0x39   :  { %717 = vrcp.f32 %v45_v34 }
  0x43   :  { %v718_v43 = vpop.eup %717 }
  0x44   :  { %v48_v46 = vmul.f32 %v718_v43, %v41_v18 }
  0x46   :  { %v71_v48 = vsel %vm69_vm0, %v48_v46, 0 }
  0x47   :  { %v146_v52 = vand.u32 4294901760, %v71_v48 }
  0x49   :  { %v147_v55 = vsub.f32 %v71_v48, %v146_v52 }
  0x4b   :  { %v148_v61 = vand.u32 4294901760, %v147_v55 }
  0x4d   :  { %434 = vmatmul.mubr.f32.vlgmr.msra.gmra.mrb[0].mxu0 %v148_v61  ;;  %v149_v2 = vsub.f32 %v147_v55, %v148_v61 }
  0x4e   :  { %683 = vmatpush1.bf16.msra.mxu0 %v682_v56  ;;  %528 = vmatprep.mubr.f32.mxu0 %v795_v0 }
  0x4f   :  { %v150_v7 = vand.u32 4294901760, %v149_v2  ;;  %685 = vmatprep.subr.bf16.mxu0 %v684_v62 }
  0x51   :  { %151 = vmatmul.mubr.f32.vlgmr.msra.gmra.mrb[0].mxu1 %v150_v7 }
  0x52   :  { %659 = vmatpush1.bf16.msra.mxu1 %v658_v3  ;;  %687 = vmatpush1.bf16.msra.mxu0 %v686_v4 }
  0x53   :  { %661 = vmatprep.subr.bf16.mxu1 %v660_v8  ;;  %689 = vmatprep.subr.bf16.mxu0 %v851_v15  ;;  %v60_v15 = vshrl.u32 %v59_v14, 7 }
  0x54   :  { %261 = vmatprep.mubr.f32.mxu1 %v795_v0 }
  0x55   :  { %530 = vmatmul.mubr.f32.vlgmr.msra.gmra.mrb[0].mxu0 %v146_v52  ;;  %v61_v16 = vsub.s32 0, %v60_v15  ;;  %v65_v18 = vsub.s32 1, %v60_v15 }
  0x56   :  { %663 = vmatpush1.bf16.msra.mxu1 %v662_v9  ;;  %691 = vmatpush1.bf16.msra.mxu0 %v857_v19 }
  0x57   :  { %665 = vmatprep.subr.bf16.mxu1 %v664_v10  ;;  %693 = vmatprep.subr.bf16.mxu0 %v859_v20  ;;  %v796_v20 = vmov 1983009808   ;;  %v62_v23 = vrot.slane %v57_v17, %v61_v16  ;;  %v66_v24 = vrot.slane %v57_v17, %v65_v18 }
  0x58   :  { %608 = vmatprep.mubr.f32.mxu0 %v795_v0  ;;  %v620_v21 = vunpack.c.l.s4 %v796_v20 }
  0x59   :  { %263 = vmatmul.mubr.f32.vlgmr.msra.gmra.mrb[0].mxu1 %v146_v52 }
  0x5a   :  { %667 = vmatpush1.bf16.msra.mxu1 %v666_v11  ;;  %695 = vmatpush1.bf16.msra.mxu0 %v868_v26  ;;  %v621_v26 = vunpack.c.0.s8 %v620_v21 }
  0x5b   :  { %669 = vmatprep.subr.bf16.mxu1 %v668_v12  ;;  %349 = vmatprep.mubr.f32.mxu1 %v795_v0 }
  0x5c   :  { %v624_v31 = vsub.s32 %v621_v26, %v60_v15 }
  0x5d   :  { %610 = vmatmul.mubr.f32.vlgmr.msra.gmra.mrb[0].mxu0 %v146_v52 }
  0x5e   :  { %671 = vmatpush1.bf16.msra.mxu1 %v670_v13 }
  0x61   :  { %352 = vmatmul.mubr.f32.vlgmr.msra.gmra.mrb[0].mxu1 %v147_v55 }
 0x130   :  { %v611_v19 = vpop.f32.mrb[0].mxu0 }
 0x131   :  { %v613_v22 = vpop.f32.mrb[1].mxu0 }
 0x134   :  { %v353_v25 = vpop.f32.mrb[0].mxu1 }
 0x135   :  { %v696_v0 = vadd.f32 %v353_v25, %v62_v23  ;;  %v355_v27 = vpop.f32.mrb[1].mxu1 }
 0x136   :  { %v698_v28 = vadd.f32 %v355_v27, %v66_v24 }
 0x137   :  { %v697_v29 = vadd.f32 %v696_v0, %v611_v19 }
 0x138   :  { %v699_v30 = vadd.f32 %v698_v28, %v613_v22 }
 0x13a   :  { %v618_v32 = vcombine.low %v697_v29, %v699_v30 }
 0x13c   :  { %v625_v33 = vrot.slane %v618_v32, %v624_v31 }
 0x13e   :  { %630 = vst.msk [vmem:[#allocation7] sm:$0xf] %vm629_vm3, %v625_v33 }
 0x13f   :  { %774 = shalt.err (!%p771_p6)
}
 0x140   :  { %s775_s15 = scalar_lea.hbm %s903_s3, 64 }
 0x141   :  { %p776_p7 = scmp.ne.s32.totalorder %s903_s3, %s775_s15  ;;  %p779_p8 = scmp.lt.u32.totalorder %s775_s15, %s903_s3 }
 0x143   :  { %p781_p9 = pnand %p779_p8, %p776_p7 }
 0x145   :  { %784 = shalt.err (!%p781_p9)
}
 0x146   :  { %640 = dma.vmem_to_hbm [thread:$0]  %s638_s12, 64, %s903_s3, [#allocation4]  }
 0x147   :  { %789 = dma.done.wait [#allocation4], 64  }
 0x148   :  { %790 = vsyncadd [#allocation4], 4294967232 }
 0x149   :  { %644 = vsyncpa [#allocation3], 1 }
 0x14a   :  { %645 = vsyncpa [#allocation6], 1 }
 0x14b   :  { %646 = vsyncpa [#allocation4], 1 }

</bundles_post_ra>
